<compile_context>
chip_gen: v5e
topology: v5e:2x2
jax: 0.10.0
libtpu: 0.0.40
codegen_flags: <defaults>
</compile_context>

<pallas_src>
import jax
import jax.numpy as jnp
from jax.experimental import pallas as pl
from jax.experimental.pallas import tpu as pltpu


def cam_kernel(x_ref, w1_ref, b1_ref, w2_ref, b2_ref, o_ref):
    bt, c, hw = x_ref.shape  # static block shape

    # ---- global max / avg pool over the flattened spatial (lane) axis ----
    xv = x_ref[...].astype(jnp.float32)               # (Bt, C, HW)
    max_pool = jnp.max(xv, axis=-1)                   # (Bt, C)
    avg_pool = jnp.sum(xv, axis=-1) * (1.0 / hw)      # (Bt, C)

    # ---- fused shared MLP: one (2*Bt, C) matmul pair instead of two ----
    pooled = jnp.concatenate([max_pool, avg_pool], axis=0)          # (2*Bt, C)
    h = jnp.dot(pooled, w1_ref[...], preferred_element_type=jnp.float32)
    h = jnp.maximum(h + b1_ref[...], 0.0)                           # ReLU
    mlp = jnp.dot(h, w2_ref[...], preferred_element_type=jnp.float32) + b2_ref[...]

    attention = mlp[:bt] + mlp[bt:]                                  # max + avg
    attention_map = jax.nn.sigmoid(attention)                        # (Bt, C)

    # ---- channel-wise scale: re-stream x from VMEM (keeps vreg pressure low) ----
    scaled = attention_map[:, :, None] * x_ref[...].astype(jnp.float32)
    o_ref[...] = scaled.astype(o_ref.dtype)


def _pick_block_b(B, bytes_per_b, budget_bytes=24 * 1024 * 1024):
    """Largest divisor of B whose pipelined footprint (in + out, double-buffered
    => ~4 live block copies) fits the VMEM budget."""
    max_bt = max(1, budget_bytes // max(1, 4 * bytes_per_b))
    block_b = max(1, min(B, max_bt))
    while B % block_b != 0:
        block_b -= 1
    return block_b
    # TODO(synk): for single batch elements whose (C, HW) slab alone exceeds the
    # VMEM budget, switch to a two-pass spatially-tiled reduce-then-scale layout.


def cam_forward(x, w1, b1, w2, b2):
    """x: (B, C, H, W). w1: (C, C//r), b1: (C//r,), w2: (C//r, C), b2: (C,).
    Returns attention_map * x with the same shape/dtype as x."""
    B, C, H, W = x.shape
    HW = H * W
    Cr = w1.shape[1]

    x_flat = x.reshape(B, C, HW)
    b1_2d = b1.reshape(1, Cr).astype(jnp.float32)
    b2_2d = b2.reshape(1, C).astype(jnp.float32)
    w1_f = w1.astype(jnp.float32)
    w2_f = w2.astype(jnp.float32)

    block_b = _pick_block_b(B, C * HW * x.dtype.itemsize)
    grid = (B // block_b,)

    out = pl.pallas_call(
        cam_kernel,
        out_shape=jax.ShapeDtypeStruct((B, C, HW), x.dtype),
        grid_spec=pltpu.PrefetchScalarGridSpec(
            num_scalar_prefetch=0,
            grid=grid,
            in_specs=[
                pl.BlockSpec((block_b, C, HW), lambda b: (b, 0, 0)),
                pl.BlockSpec((C, Cr), lambda b: (0, 0)),
                pl.BlockSpec((1, Cr), lambda b: (0, 0)),
                pl.BlockSpec((Cr, C), lambda b: (0, 0)),
                pl.BlockSpec((1, C), lambda b: (0, 0)),
            ],
            out_specs=pl.BlockSpec((block_b, C, HW), lambda b: (b, 0, 0)),
        ),
        compiler_params=pltpu.CompilerParams(
            dimension_semantics=("parallel",),
        ),
    )(x_flat, w1_f, b1_2d, w2_f, b2_2d)

    return out.reshape(B, C, H, W)


def cam_reference(x, w1, b1, w2, b2):
    """Pure-JAX reference of the PyTorch forward pass."""
    B, C, H, W = x.shape
    max_pool = jnp.max(x.reshape(B, C, -1), axis=-1)
    avg_pool = jnp.mean(x.reshape(B, C, -1), axis=-1)

    def mlp(v):
        h = jnp.maximum(v @ w1 + b1, 0.0)
        return h @ w2 + b2

    att = jax.nn.sigmoid(mlp(max_pool) + mlp(avg_pool))
    return att[:, :, None, None] * x


if __name__ == "__main__":
    B, C, H, W = 2, 4, 16, 16
    r = 2
    Cr = C // r

    key = jax.random.PRNGKey(0)
    kx, k1, k2, k3, k4 = jax.random.split(key, 5)

    x = jax.random.normal(kx, (B, C, H, W), dtype=jnp.float32)

    # nn.Linear weights stored pre-transposed as (in, out) for right-multiplication.
    w1 = jax.random.normal(k1, (C, Cr), dtype=jnp.float32) * 0.1
    b1 = jax.random.normal(k2, (Cr,), dtype=jnp.float32) * 0.1
    w2 = jax.random.normal(k3, (Cr, C), dtype=jnp.float32) * 0.1
    b2 = jax.random.normal(k4, (C,), dtype=jnp.float32) * 0.1

    out = cam_forward(x, w1, b1, w2, b2)
    jax.block_until_ready(out)

    ref = cam_reference(x, w1, b1, w2, b2)
    assert out.shape == (B, C, H, W)
    assert jnp.allclose(out, ref, atol=1e-5, rtol=1e-5), "mismatch vs reference"

    print("KERNEL_OK")
</pallas_src>

<mosaic_0001>
module attributes {stable_mosaic.version = 11 : i64} {
  func.func @cam_kernel(%arg0: i32, %arg1: memref<2x4x256xf32, #tpu.memory_space<vmem>>, %arg2: memref<4x2xf32, #tpu.memory_space<vmem>>, %arg3: memref<1x2xf32, #tpu.memory_space<vmem>>, %arg4: memref<2x4xf32, #tpu.memory_space<vmem>>, %arg5: memref<1x4xf32, #tpu.memory_space<vmem>>, %arg6: memref<2x4x256xf32, #tpu.memory_space<vmem>>) attributes {dimension_semantics = [#tpu.dimension_semantics<parallel>], iteration_bounds = array<i64: 1>, scalar_prefetch = 0 : i64, scratch_operands = 0 : i64, tpu.core_type = #tpu.core_type<tc>, window_params = [{transform_indices = @transform_0, window_bounds = array<i64: 2, 4, 256>}, {pipeline_mode = #tpu.pipeline_mode<synchronous>, transform_indices = @transform_1, window_bounds = array<i64: 4, 2>}, {pipeline_mode = #tpu.pipeline_mode<synchronous>, transform_indices = @transform_2, window_bounds = array<i64: 1, 2>}, {pipeline_mode = #tpu.pipeline_mode<synchronous>, transform_indices = @transform_3, window_bounds = array<i64: 2, 4>}, {pipeline_mode = #tpu.pipeline_mode<synchronous>, transform_indices = @transform_4, window_bounds = array<i64: 1, 4>}, {transform_indices = @transform_5, window_bounds = array<i64: 2, 4, 256>}]} {
    %c0 = arith.constant 0 : index
    %c0_0 = arith.constant 0 : index
    %c0_1 = arith.constant 0 : index
    %0 = vector.load %arg1[%c0, %c0_0, %c0_1] : memref<2x4x256xf32, #tpu.memory_space<vmem>>, vector<2x4x256xf32>
    %cst = arith.constant dense<0xFF800000> : vector<2x4xf32>
    %1 = vector.multi_reduction <maximumf>, %0, %cst [2] : vector<2x4x256xf32> to vector<2x4xf32>
    %cst_2 = arith.constant dense<0.000000e+00> : vector<2x4xf32>
    %2 = vector.multi_reduction <add>, %0, %cst_2 [2] : vector<2x4x256xf32> to vector<2x4xf32>
    %cst_3 = arith.constant 3.906250e-03 : f32
    %3 = vector.broadcast %cst_3 : f32 to vector<2x4xf32>
    %4 = arith.mulf %2, %3 : vector<2x4xf32>
    %5 = tpu.concatenate %1, %4 in 0 : vector<2x4xf32>, vector<2x4xf32> -> vector<4x4xf32>
    %c0_4 = arith.constant 0 : index
    %c0_5 = arith.constant 0 : index
    %6 = vector.load %arg2[%c0_4, %c0_5] : memref<4x2xf32, #tpu.memory_space<vmem>>, vector<4x2xf32>
    %cst_6 = arith.constant dense<0.000000e+00> : vector<4x2xf32>
    %7 = tpu.matmul %5, %6, %cst_6 {dimension_numbers = #tpu.dot_dimension_numbers<[1], [0], [0], [1], [0, 0, 1, 1], [], []>} : vector<4x4xf32>, vector<4x2xf32>, vector<4x2xf32> -> vector<4x2xf32>
    %c0_7 = arith.constant 0 : index
    %c0_8 = arith.constant 0 : index
    %8 = vector.load %arg3[%c0_7, %c0_8] : memref<1x2xf32, #tpu.memory_space<vmem>>, vector<1x2xf32>
    %9 = vector.broadcast %8 : vector<1x2xf32> to vector<4x2xf32>
    %10 = arith.addf %7, %9 : vector<4x2xf32>
    %cst_9 = arith.constant 0.000000e+00 : f32
    %11 = vector.broadcast %cst_9 : f32 to vector<4x2xf32>
    %12 = arith.maximumf %10, %11 : vector<4x2xf32>
    %c0_10 = arith.constant 0 : index
    %c0_11 = arith.constant 0 : index
    %13 = vector.load %arg4[%c0_10, %c0_11] : memref<2x4xf32, #tpu.memory_space<vmem>>, vector<2x4xf32>
    %cst_12 = arith.constant dense<0.000000e+00> : vector<4x4xf32>
    %14 = tpu.matmul %12, %13, %cst_12 {dimension_numbers = #tpu.dot_dimension_numbers<[1], [0], [0], [1], [0, 0, 1, 1], [], []>} : vector<4x2xf32>, vector<2x4xf32>, vector<4x4xf32> -> vector<4x4xf32>
    %c0_13 = arith.constant 0 : index
    %c0_14 = arith.constant 0 : index
    %15 = vector.load %arg5[%c0_13, %c0_14] : memref<1x4xf32, #tpu.memory_space<vmem>>, vector<1x4xf32>
    %16 = vector.broadcast %15 : vector<1x4xf32> to vector<4x4xf32>
    %17 = arith.addf %14, %16 : vector<4x4xf32>
    %18 = vector.extract_strided_slice %17 {offsets = [0, 0], sizes = [2, 4], strides = [1, 1]} : vector<4x4xf32> to vector<2x4xf32>
    %19 = vector.extract_strided_slice %17 {offsets = [2, 0], sizes = [2, 4], strides = [1, 1]} : vector<4x4xf32> to vector<2x4xf32>
    %20 = arith.addf %18, %19 : vector<2x4xf32>
    %21 = arith.negf %20 : vector<2x4xf32>
    %22 = math.exp %21 : vector<2x4xf32>
    %cst_15 = arith.constant 1.000000e+00 : f32
    %23 = vector.broadcast %cst_15 : f32 to vector<2x4xf32>
    %24 = arith.addf %23, %22 : vector<2x4xf32>
    %25 = arith.divf %23, %24 : vector<2x4xf32>
    %26 = vector.shape_cast %25 : vector<2x4xf32> to vector<2x4x1xf32>
    %c0_16 = arith.constant 0 : index
    %c0_17 = arith.constant 0 : index
    %c0_18 = arith.constant 0 : index
    %27 = vector.load %arg1[%c0_16, %c0_17, %c0_18] : memref<2x4x256xf32, #tpu.memory_space<vmem>>, vector<2x4x256xf32>
    %28 = vector.broadcast %26 : vector<2x4x1xf32> to vector<2x4x256xf32>
    %29 = arith.mulf %28, %27 : vector<2x4x256xf32>
    %c0_19 = arith.constant 0 : index
    %c0_20 = arith.constant 0 : index
    %c0_21 = arith.constant 0 : index
    %30 = vector.load %arg6[%c0_19, %c0_20, %c0_21] : memref<2x4x256xf32, #tpu.memory_space<vmem>>, vector<2x4x256xf32>
    tpu.vector_store %arg6[%c0_19, %c0_20, %c0_21], %29 {strides = array<i32>} : memref<2x4x256xf32, #tpu.memory_space<vmem>>, vector<2x4x256xf32>,
    return
  }
  func.func @transform_0(%arg0: i32) -> (i32, i32, i32) {
    %c0_i32 = arith.constant 0 : i32
    %c0_i32_0 = arith.constant 0 : i32
    %c0_i32_1 = arith.constant 0 : i32
    return %arg0, %c0_i32, %c0_i32_0 : i32, i32, i32
  }
  func.func @transform_1(%arg0: i32) -> (i32, i32) {
    %c0_i32 = arith.constant 0 : i32
    %c0_i32_0 = arith.constant 0 : i32
    %c0_i32_1 = arith.constant 0 : i32
    return %c0_i32, %c0_i32_0 : i32, i32
  }
  func.func @transform_2(%arg0: i32) -> (i32, i32) {
    %c0_i32 = arith.constant 0 : i32
    %c0_i32_0 = arith.constant 0 : i32
    %c0_i32_1 = arith.constant 0 : i32
    return %c0_i32, %c0_i32_0 : i32, i32
  }
  func.func @transform_3(%arg0: i32) -> (i32, i32) {
    %c0_i32 = arith.constant 0 : i32
    %c0_i32_0 = arith.constant 0 : i32
    %c0_i32_1 = arith.constant 0 : i32
    return %c0_i32, %c0_i32_0 : i32, i32
  }
  func.func @transform_4(%arg0: i32) -> (i32, i32) {
    %c0_i32 = arith.constant 0 : i32
    %c0_i32_0 = arith.constant 0 : i32
    %c0_i32_1 = arith.constant 0 : i32
    return %c0_i32, %c0_i32_0 : i32, i32
  }
  func.func @transform_5(%arg0: i32) -> (i32, i32, i32) {
    %c0_i32 = arith.constant 0 : i32
    %c0_i32_0 = arith.constant 0 : i32
    %c0_i32_1 = arith.constant 0 : i32
    return %arg0, %c0_i32, %c0_i32_0 : i32, i32, i32
  }
}

</mosaic_0001>

<bundles_post_ra>
// kernel: tpu_custom_call.1
= control target key start
LH: loop header
LB: loop body
LE: loop exit
PB: predicated region body
PF: predicated region fallthrough
CT: control target
= control target key end

     0   :  { %10 = vsyncpa [#allocation3], 0  ;;  %s390_s0 = inlined_call_operand.hbm [shape: f32[2,4,256], index: 0, kind: input, shape index: {}]   ;;  %s391_s1 = inlined_call_operand.vmem [shape: f32[4,2], index: 1, kind: input, shape index: {}]   ;;  %s392_s2 = inlined_call_operand.vmem [shape: f32[1,2], index: 2, kind: input, shape index: {}]   ;;  %s393_s3 = inlined_call_operand.vmem [shape: f32[2,4], index: 3, kind: input, shape index: {}]   ;;  %s394_s4 = inlined_call_operand.vmem [shape: f32[1,4], index: 4, kind: input, shape index: {}]   ;;  %s395_s5 = inlined_call_operand.hbm [shape: f32[2,4,256], index: 5, kind: output, shape index: {}]  }
   0x1   :  { %11 = vsyncpa [#allocation4], 0  ;;  %s16_s20 = sshll.u32 %s390_s0, 4  ;;  %s321_s21 = smov [#allocation2]   ;;  %s17_s20 = int_to_ptr.hbm [resolvable:$true] %s16_s20 }
   0x2   :  { %s18_s22 = sshll.u32 %s321_s21, 4  ;;  %s322_s23 = smov 128   ;;  %s19_s22 = int_to_ptr.vmem [resolvable:$true] %s18_s22 }
   0x3   :  { %s323_s24 = smov 8  }
   0x4   :  { %24 = dma.hbm_to_vmem [thread:$0]  %s17_s20, 256, %s19_s22, [#allocation3], %s322_s23, %s322_s23, %s323_s24  }
   0x5   :  { %317 = dma.done.wait [#allocation3], 256  }
   0x6   :  { %318 = vsyncadd [#allocation3], 4294967040  ;;  %v37_v0 = vld [vmem:[#allocation2] sm:$0xff]  ;;  %v38_v1 = vld [vmem:[#allocation2 + $0x8] sm:$0xff]  ;;  %vm52_vm0 = vcmask 1043456   ;;  %v88_v25 = vlaneseq  ;;  %vm92_vm1 = vcmask 1041409  }
   0x7   :  { %41 = vst [vmem:[#allocation1] ss:$2 sm:$0xff] %v37_v0  ;;  %v104_v22 = vld [vmem:[%s391_s1] sm:$0xf]  ;;  %vm99_vm2 = vcmask 1043459   ;;  %vm102_vm3 = vcmask 1041408  }
   0x8   :  { %45 = vst [vmem:[#allocation1 + $0x10] ss:$2 sm:$0xff] %v38_v1  ;;  %252 = vmatpush.msk.msra.mxu0 %vm52_vm0, %v104_v22  ;;  %v89_v26 = vand.u32 127, %v88_v25  ;;  %vm109_vm4 = vcmask 31744   ;;  %v137_v38 = vld [vmem:[%s393_s3] sm:$0x3] }
   0x9   :  { %254 = vmatpush.msk.msra.mxu1 %vm102_vm3, %v137_v38  ;;  %v263_v39 = vld [vmem:[%s392_s2] ss:$0 sm:$0xff]  ;;  %vm142_vm5 = vcmask 15360   ;;  %v194_v43 = vshrl.u32 %v88_v25, 7  ;;  %s324_s2 = smov [#allocation5]   ;;  %s239_s7 = sshll.u32 %s395_s5, 4  ;;  %s240_s7 = int_to_ptr.hbm [resolvable:$true] %s239_s7 }
   0xa   :  { %v264_v44 = vld [vmem:[%s394_s4] ss:$0 sm:$0xff]  ;;  %s237_s3 = sshll.u32 %s324_s2, 4  ;;  %s238_s3 = int_to_ptr.vmem [resolvable:$true] %s237_s3 }
   0xb   :  { %261 = vset.pattern.permute.xlu2 %v194_v43  ;;  %262 = vset.pattern.permute.xlu0 %v194_v43 }
   0xe   :  { %v42_v2 = vld.sshfl [vmem:[#allocation1] sm:$0xff pattern:$0x75316420]  ;;  %v43_v3 = vld.sshfl [vmem:[#allocation1 + $0x8] sm:$0xff pattern:$0x75316420] }
   0xf   :  { %v53_v4 = vsel %vm52_vm0, %v42_v2, -inf  ;;  %v54_v5 = vsel %vm52_vm0, %v43_v3, -inf  ;;  %63 = vst [vmem:[#allocation1] ss:$2 sm:$0xff] %v37_v0 }
  0x10   :  { %v55_v6 = vmax.f32 %v53_v4, %v54_v5  ;;  %v46_v7 = vld.sshfl [vmem:[#allocation1 + $0x10] sm:$0xff pattern:$0x75316420]  ;;  %v47_v8 = vld.sshfl [vmem:[#allocation1 + $0x18] sm:$0xff pattern:$0x75316420] }
  0x11   :  { %67 = vst [vmem:[#allocation1 + $0x10] ss:$2 sm:$0xff] %v38_v1  ;;  %v58_v9 = vsel %vm52_vm0, %v46_v7, -inf  ;;  %v59_v10 = vsel %vm52_vm0, %v47_v8, -inf }
  0x12   :  { %56 = vmax.xlane.f32.xlu1 %v55_v6  ;;  %v60_v13 = vmax.f32 %v58_v9, %v59_v10 }
  0x16   :  { %v64_v11 = vld.sshfl [vmem:[#allocation1] sm:$0xff pattern:$0x75316420]  ;;  %v65_v12 = vld.sshfl [vmem:[#allocation1 + $0x8] sm:$0xff pattern:$0x75316420] }
  0x17   :  { %v74_v14 = vsel %vm52_vm0, %v64_v11, 0.0  ;;  %v75_v15 = vsel %vm52_vm0, %v65_v12, 0.0  ;;  %206 = vst [vmem:[#allocation1] ss:$2 sm:$0xff] %v37_v0 }
  0x18   :  { %v76_v16 = vadd.f32 %v75_v15, %v74_v14  ;;  %v68_v17 = vld.sshfl [vmem:[#allocation1 + $0x10] sm:$0xff pattern:$0x75316420]  ;;  %v69_v18 = vld.sshfl [vmem:[#allocation1 + $0x18] sm:$0xff pattern:$0x75316420] }
  0x19   :  { %210 = vst [vmem:[#allocation1 + $0x10] ss:$2 sm:$0xff] %v38_v1  ;;  %v79_v19 = vsel %vm52_vm0, %v68_v17, 0.0  ;;  %v80_v20 = vsel %vm52_vm0, %v69_v18, 0.0 }
  0x1a   :  { %77 = vadd.xlane.f32.xlu0 %v76_v16  ;;  %61 = vmax.xlane.f32.xlu1 %v60_v13  ;;  %v81_v21 = vadd.f32 %v80_v20, %v79_v19 }
  0x1e   :  { %v208_v0 = vld.sshfl [vmem:[#allocation1 + $0x8] sm:$0xff pattern:$0x75316420]  ;;  %v207_v1 = vld.sshfl [vmem:[#allocation1] sm:$0xff pattern:$0x75316420] }
  0x20   :  { %v212_v7 = vld.sshfl [vmem:[#allocation1 + $0x18] sm:$0xff pattern:$0x75316420]  ;;  %v211_v8 = vld.sshfl [vmem:[#allocation1 + $0x10] sm:$0xff pattern:$0x75316420] }
  0x22   :  { %82 = vadd.xlane.f32.xlu0 %v81_v21 }
  0x85   :  { %v57_v23 = vpop.xlane.xlu1 %56 }
  0x86   :  { %v90_v30 = vperm.slane %v57_v23, %v89_v26 }
  0x8d   :  { %v78_v24 = vpop.xlane.xlu0 %77  ;;  %v62_v27 = vpop.xlane.xlu1 %61 }
  0x8e   :  { %v84_v28 = vmul.f32 0.00390625, %v78_v24  ;;  %v91_v31 = vperm.slane %v62_v27, %v89_v26 }
  0x90   :  { %v97_v33 = vperm.slane %v84_v28, %v89_v26  ;;  %v93_v35 = vsel %vm92_vm1, %v91_v31, %v90_v30 }
  0x95   :  { %v83_v29 = vpop.xlane.xlu0 %82 }
  0x96   :  { %v85_v32 = vmul.f32 0.00390625, %v83_v29 }
  0x98   :  { %v98_v34 = vperm.slane %v85_v32, %v89_v26 }
  0x9a   :  { %v100_v36 = vsel %vm99_vm2, %v98_v34, %v97_v33 }
  0x9b   :  { %v103_v37 = vsel %vm102_vm3, %v93_v35, %v100_v36 }
  0x9c   :  { %253 = vmatmul.msk.f32.vlgmr.msra.gmra.mxu0 %vm109_vm4, %v103_v37 }
 0x119   :  { %v133_v40 = vpop.f32.mrf.mxu0 }
 0x11a   :  { %v134_v41 = vadd.f32 %v263_v39, %v133_v40 }
 0x11c   :  { %v136_v42 = vmax.f32 %v134_v41, 0.0 }
 0x11e   :  { %255 = vmatmul.msk.f32.vlgmr.msra.gmra.mxu1 %vm142_vm5, %v136_v42 }
 0x19b   :  { %v166_v45 = vpop.f32.mrf.mxu1 }
 0x19c   :  { %v167_v46 = vadd.f32 %v264_v44, %v166_v45 }
 0x19e   :  { %v170_v47 = vrot.slane %v167_v46, 2 }
 0x1a0   :  { %v172_v48 = vadd.f32 %v170_v47, %v167_v46 }
 0x1a2   :  { %v256_v49 = vmul.f32 -1.442695, %v172_v48 }
 0x1a4   :  { %265 = vpow2.f32 %v256_v49 }
 0x1aa   :  { %v266_v50 = vpop.eup %265 }
 0x1ab   :  { %v176_v51 = vadd.f32 1.0, %v266_v50 }
 0x1ad   :  { %267 = vrcp.f32 %v176_v51  ;;  %v188_v55 = vand.u32 2147483648, %v176_v51  ;;  %v186_v57 = vand.u32 2147483647, %v176_v51  ;;  %vm182_vm7 = vweird.f32 %v176_v51 }
 0x1af   :  { %v189_v59 = vor.u32 1.1754944e-38, %v188_v55  ;;  %vm187_vm9 = vcmp.eq.f32.partialorder %v186_v57, 8.507059e+37 }
 0x1b3   :  { %v268_v52 = vpop.eup %267 }
 0x1b4   :  { %v178_v53 = vmul.f32 %v268_v52, %v176_v51  ;;  %vm183_vm6 = vweird.f32 %v268_v52 }
 0x1b5   :  { %vm184_vm8 = vmor %vm182_vm7, %vm183_vm6 }
 0x1b6   :  { %v179_v54 = vsub.f32 1.0, %v178_v53 }
 0x1b8   :  { %v180_v56 = vmul.f32 %v268_v52, %v179_v54 }
 0x1ba   :  { %v181_v58 = vadd.f32 %v268_v52, %v180_v56 }
 0x1bc   :  { %v185_v60 = vsel %vm184_vm8, %v268_v52, %v181_v58 }
 0x1bd   :  { %v190_v61 = vsel %vm187_vm9, %v189_v59, %v185_v60 }
 0x1be   :  { %v192_v62 = vperm.slane %v190_v61, 0  ;;  %v199_v63 = vperm.slane %v190_v61, 1 }
 0x1c0   :  { %197 = vperm.xlu2 %261, %v192_v62  }
 0x1c8   :  { %204 = vperm.xlu2 %261, %v199_v63  }
 0x21a   :  { %v198_v2 = vpop.permute.xlu2 %197 }
 0x21b   :  { %v218_v3 = vmul.f32 %v208_v0, %v198_v2  ;;  %v217_v4 = vmul.f32 %v207_v1, %v198_v2 }
 0x21d   :  { %v225_v5 = vrot.slane %v218_v3, 4 }
 0x21f   :  { %v227_v6 = vsel %vm52_vm0, %v217_v4, %v225_v5 }
 0x220   :  { %231 = vst [vmem:[#allocation5] sm:$0xff] %v227_v6 }
 0x222   :  { %v205_v9 = vpop.permute.xlu2 %204 }
 0x223   :  { %v220_v10 = vmul.f32 %v212_v7, %v205_v9  ;;  %v219_v11 = vmul.f32 %v211_v8, %v205_v9 }
 0x225   :  { %v226_v12 = vrot.slane %v220_v10, 4 }
 0x227   :  { %v228_v13 = vsel %vm52_vm0, %v219_v11, %v226_v12 }
 0x228   :  { %232 = vst [vmem:[#allocation5 + $0x8] sm:$0xff] %v228_v13 }
 0x229   :  { %245 = dma.vmem_to_hbm [thread:$0]  %s238_s3, 256, %s240_s7, [#allocation4], %s322_s23, %s322_s23, %s323_s24  }
 0x22a   :  { %319 = dma.done.wait [#allocation4], 256  }
 0x22b   :  { %320 = vsyncadd [#allocation4], 4294967040 }
 0x22c   :  { %250 = vsyncpa [#allocation3], 1 }
 0x22d   :  { %251 = vsyncpa [#allocation4], 1 }

</bundles_post_ra>
